<compile_context>
chip_gen: v5e
topology: v5e:2x2
jax: 0.10.0
libtpu: 0.0.40
codegen_flags: <defaults>
</compile_context>

<pallas_src>
import functools

import jax
import jax.numpy as jnp
from jax.experimental import pallas as pl
from jax.experimental.pallas import tpu as pltpu


# ---------------------------------------------------------------------------
# Kernel bodies
# ---------------------------------------------------------------------------


def _split_copy_kernel(xe_ref, xo_ref, even_ref, odd_ref):
    # D % 128 == 0 path: the column selection already happened in the
    # BlockSpecs, so this is two unmasked, full-lane VMEM copies.
    even_ref[...] = xe_ref[...]
    odd_ref[...] = xo_ref[...]


def _split_slice_kernel(x_ref, even_ref, odd_ref):
    # Fallback path: x_ref block is (tile_r, 2*D); cols [0, D) = even step,
    # [D, 2D) = odd step -> static lane-contiguous slices.
    d = even_ref.shape[-1]
    x = x_ref[...]
    even_ref[...] = x[:, :d]
    odd_ref[...] = x[:, d:]


def _split_regroup_kernel(x_ref, even_ref, odd_ref, *, k, d):
    # Lane-dense path: x_ref block is (tile_g, 2*k*d), one row holds k
    # (even, odd) time-step pairs.  Regroup the k even / k odd D-chunks into
    # 128-lane output rows so the stores are unmasked full-lane vst.
    x = x_ref[...]
    even_ref[...] = jnp.concatenate(
        [x[:, (2 * j) * d:(2 * j + 1) * d] for j in range(k)], axis=-1)
    odd_ref[...] = jnp.concatenate(
        [x[:, (2 * j + 1) * d:(2 * j + 2) * d] for j in range(k)], axis=-1)


# ---------------------------------------------------------------------------
# Tiling helpers
# ---------------------------------------------------------------------------


def _budget_for_device():
    """(double-buffered in-flight budget, vmem_limit_bytes) per generation."""
    kind = ""
    try:
        kind = jax.devices()[0].device_kind.lower()
    except Exception:  # pragma: no cover - defensive only
        pass
    if "v5" in kind:
        # v5e: 16 MiB default scoped VMEM; at ~0.82 TB/s HBM a ~10 MiB
        # in-flight footprint already keeps per-step overhead in the noise.
        return 10 * 1024 * 1024, 16 * 1024 * 1024
    # v6e / v7x (and unknown): 32 MiB scoped VMEM; at 1.4-3.2 TB/s the bigger
    # tile is what amortizes the ~0.35 us/step grid overhead.
    return 20 * 1024 * 1024, 32 * 1024 * 1024


def _choose_tile_rows(n_rows, row_bytes_in_flight, budget_bytes, multiple=32):
    """Largest row tile whose double-buffered footprint fits the budget.

    row_bytes_in_flight already includes double-buffering and all blocks
    (input + both outputs) held per row per grid step.  No hard cap beyond
    the budget (review: the old 4096-row cap inflated per-step overhead for
    small D).  Multiple of 32 covers f32/bf16/int8 sublane packing; the full
    extent is always a legal block shape.
    """
    max_rows = budget_bytes // max(row_bytes_in_flight, 1)
    max_rows = (max_rows // multiple) * multiple
    if max_rows <= 0:
        max_rows = 8
    if n_rows <= max_rows:
        return n_rows
    return max_rows


# ---------------------------------------------------------------------------
# Public entry point
# ---------------------------------------------------------------------------


def splitting(x):
    """Pallas implementation of Splitting.forward.

    Args:
      x: (B, T, D) array, T must be even (matches SCINet's even/odd split).
    Returns:
      (even, odd): each (B, T//2, D), same dtype as x.
    """
    B, T, D = x.shape
    assert T % 2 == 0, "sequence length must be even for the SCINet split"
    Th = T // 2
    n_rows = B * Th
    itemsize = jnp.dtype(x.dtype).itemsize

    budget, vmem_limit = _budget_for_device()
    compiler_params = pltpu.CompilerParams(
        dimension_semantics=("parallel",),
        vmem_limit_bytes=vmem_limit,
    )
    # Pure data movement: read 2*n_rows*D elems, write 2*n_rows*D elems.
    cost = pl.CostEstimate(
        flops=0,
        transcendentals=0,
        bytes_accessed=4 * n_rows * D * itemsize,
    )

    # ---- Path 1: D is a multiple of 128 -> split purely via BlockSpecs. ----
    if D % 128 == 0:
        x2 = x.reshape(n_rows, 2 * D)
        # Per pair-row in flight: 2 input halves + 2 outputs = 4*D elems,
        # double-buffered -> 8*D*itemsize bytes.
        tile_r = _choose_tile_rows(n_rows, 8 * D * itemsize, budget)
        grid = (pl.cdiv(n_rows, tile_r),)
        even2, odd2 = pl.pallas_call(
            _split_copy_kernel,
            out_shape=(
                jax.ShapeDtypeStruct((n_rows, D), x.dtype),
                jax.ShapeDtypeStruct((n_rows, D), x.dtype),
            ),
            grid_spec=pltpu.PrefetchScalarGridSpec(
                num_scalar_prefetch=0,
                grid=grid,
                in_specs=[
                    pl.BlockSpec((tile_r, D), lambda i: (i, 0)),  # even cols
                    pl.BlockSpec((tile_r, D), lambda i: (i, 1)),  # odd cols
                ],
                out_specs=[
                    pl.BlockSpec((tile_r, D), lambda i: (i, 0)),
                    pl.BlockSpec((tile_r, D), lambda i: (i, 0)),
                ],
            ),
            compiler_params=compiler_params,
            cost_estimate=cost,
        )(x2, x2)
        return even2.reshape(B, Th, D), odd2.reshape(B, Th, D)

    # ---- Path 2: small D dividing 128 -> lane-dense regrouped outputs. ----
    if D < 128 and 128 % D == 0:
        k = 128 // D
        if k <= 8 and n_rows % k == 0:
            n_g = n_rows // k
            x2g = x.reshape(n_g, 2 * k * D)  # free row-major view
            # Per group-row in flight: input 2*k*D + outputs 2*k*D elems,
            # double-buffered -> 8*k*D*itemsize bytes.
            tile_g = _choose_tile_rows(n_g, 8 * k * D * itemsize, budget)
            grid = (pl.cdiv(n_g, tile_g),)
            even2, odd2 = pl.pallas_call(
                functools.partial(_split_regroup_kernel, k=k, d=D),
                out_shape=(
                    jax.ShapeDtypeStruct((n_g, k * D), x.dtype),
                    jax.ShapeDtypeStruct((n_g, k * D), x.dtype),
                ),
                grid_spec=pltpu.PrefetchScalarGridSpec(
                    num_scalar_prefetch=0,
                    grid=grid,
                    in_specs=[
                        pl.BlockSpec((tile_g, 2 * k * D), lambda i: (i, 0)),
                    ],
                    out_specs=[
                        pl.BlockSpec((tile_g, k * D), lambda i: (i, 0)),
                        pl.BlockSpec((tile_g, k * D), lambda i: (i, 0)),
                    ],
                ),
                compiler_params=compiler_params,
                cost_estimate=cost,
            )(x2g)
            return even2.reshape(B, Th, D), odd2.reshape(B, Th, D)

    # ---- Path 3: fallback -- in-kernel lane slice on the (n_rows, 2D) view.
    x2 = x.reshape(n_rows, 2 * D)
    tile_r = _choose_tile_rows(n_rows, 8 * D * itemsize, budget)
    grid = (pl.cdiv(n_rows, tile_r),)
    even2, odd2 = pl.pallas_call(
        _split_slice_kernel,
        out_shape=(
            jax.ShapeDtypeStruct((n_rows, D), x.dtype),
            jax.ShapeDtypeStruct((n_rows, D), x.dtype),
        ),
        grid_spec=pltpu.PrefetchScalarGridSpec(
            num_scalar_prefetch=0,
            grid=grid,
            in_specs=[pl.BlockSpec((tile_r, 2 * D), lambda i: (i, 0))],
            out_specs=[
                pl.BlockSpec((tile_r, D), lambda i: (i, 0)),
                pl.BlockSpec((tile_r, D), lambda i: (i, 0)),
            ],
        ),
        compiler_params=compiler_params,
        cost_estimate=cost,
    )(x2)
    return even2.reshape(B, Th, D), odd2.reshape(B, Th, D)


if __name__ == "__main__":
    key = jax.random.PRNGKey(0)

    def check(x):
        even, odd = splitting(x)
        jax.block_until_ready((even, odd))
        ref_even = x[:, ::2, :]
        ref_odd = x[:, 1::2, :]
        assert even.shape == ref_even.shape and odd.shape == ref_odd.shape
        assert jnp.array_equal(even, ref_even)
        assert jnp.array_equal(odd, ref_odd)

    # Primary shapes consistent with (batch, seq, hidden); D=32 exercises the
    # lane-dense regroup path (k = 4).
    B, T, D = 2, 8, 32
    x = jax.random.normal(key, (B, T, D), dtype=jnp.float32)
    check(x)

    # D % 128 == 0 path (BlockSpec column split) with packed bf16.
    x_bf = jax.random.normal(jax.random.PRNGKey(0), (2, 64, 128)).astype(jnp.bfloat16)
    check(x_bf)

    # Fallback path (D does not divide 128).
    x_f = jax.random.normal(jax.random.PRNGKey(0), (2, 8, 48), dtype=jnp.float32)
    check(x_f)

    print("KERNEL_OK")
</pallas_src>

<mosaic_0001>
module attributes {stable_mosaic.version = 11 : i64} {
  func.func @_split_regroup_kernel(%arg0: i32, %arg1: memref<2x256xf32, #tpu.memory_space<vmem>>, %arg2: memref<2x128xf32, #tpu.memory_space<vmem>>, %arg3: memref<2x128xf32, #tpu.memory_space<vmem>>) attributes {dimension_semantics = [#tpu.dimension_semantics<parallel>], iteration_bounds = array<i64: 1>, scalar_prefetch = 0 : i64, scratch_operands = 0 : i64, tpu.core_type = #tpu.core_type<tc>, window_params = [{transform_indices = @transform_0, window_bounds = array<i64: 2, 256>}, {transform_indices = @transform_1, window_bounds = array<i64: 2, 128>}, {transform_indices = @transform_2, window_bounds = array<i64: 2, 128>}]} {
    %c0 = arith.constant 0 : index
    %c0_0 = arith.constant 0 : index
    %0 = vector.load %arg1[%c0, %c0_0] : memref<2x256xf32, #tpu.memory_space<vmem>>, vector<2x256xf32>
    %1 = vector.extract_strided_slice %0 {offsets = [0, 0], sizes = [2, 32], strides = [1, 1]} : vector<2x256xf32> to vector<2x32xf32>
    %2 = vector.extract_strided_slice %0 {offsets = [0, 64], sizes = [2, 32], strides = [1, 1]} : vector<2x256xf32> to vector<2x32xf32>
    %3 = vector.extract_strided_slice %0 {offsets = [0, 128], sizes = [2, 32], strides = [1, 1]} : vector<2x256xf32> to vector<2x32xf32>
    %4 = vector.extract_strided_slice %0 {offsets = [0, 192], sizes = [2, 32], strides = [1, 1]} : vector<2x256xf32> to vector<2x32xf32>
    %5 = tpu.concatenate %1, %2, %3, %4 in 1 : vector<2x32xf32>, vector<2x32xf32>, vector<2x32xf32>, vector<2x32xf32> -> vector<2x128xf32>
    %c0_1 = arith.constant 0 : index
    %c0_2 = arith.constant 0 : index
    %6 = vector.load %arg2[%c0_1, %c0_2] : memref<2x128xf32, #tpu.memory_space<vmem>>, vector<2x128xf32>
    tpu.vector_store %arg2[%c0_1, %c0_2], %5 {strides = array<i32>} : memref<2x128xf32, #tpu.memory_space<vmem>>, vector<2x128xf32>,
    %7 = vector.extract_strided_slice %0 {offsets = [0, 32], sizes = [2, 32], strides = [1, 1]} : vector<2x256xf32> to vector<2x32xf32>
    %8 = vector.extract_strided_slice %0 {offsets = [0, 96], sizes = [2, 32], strides = [1, 1]} : vector<2x256xf32> to vector<2x32xf32>
    %9 = vector.extract_strided_slice %0 {offsets = [0, 160], sizes = [2, 32], strides = [1, 1]} : vector<2x256xf32> to vector<2x32xf32>
    %10 = vector.extract_strided_slice %0 {offsets = [0, 224], sizes = [2, 32], strides = [1, 1]} : vector<2x256xf32> to vector<2x32xf32>
    %11 = tpu.concatenate %7, %8, %9, %10 in 1 : vector<2x32xf32>, vector<2x32xf32>, vector<2x32xf32>, vector<2x32xf32> -> vector<2x128xf32>
    %c0_3 = arith.constant 0 : index
    %c0_4 = arith.constant 0 : index
    %12 = vector.load %arg3[%c0_3, %c0_4] : memref<2x128xf32, #tpu.memory_space<vmem>>, vector<2x128xf32>
    tpu.vector_store %arg3[%c0_3, %c0_4], %11 {strides = array<i32>} : memref<2x128xf32, #tpu.memory_space<vmem>>, vector<2x128xf32>,
    return
  }
  func.func @transform_0(%arg0: i32) -> (i32, i32) {
    %c0_i32 = arith.constant 0 : i32
    %c0_i32_0 = arith.constant 0 : i32
    return %arg0, %c0_i32 : i32, i32
  }
  func.func @transform_1(%arg0: i32) -> (i32, i32) {
    %c0_i32 = arith.constant 0 : i32
    %c0_i32_0 = arith.constant 0 : i32
    return %arg0, %c0_i32 : i32, i32
  }
  func.func @transform_2(%arg0: i32) -> (i32, i32) {
    %c0_i32 = arith.constant 0 : i32
    %c0_i32_0 = arith.constant 0 : i32
    return %arg0, %c0_i32 : i32, i32
  }
}

</mosaic_0001>

<bundles_post_ra>
// kernel: tpu_custom_call.1
= control target key start
LH: loop header
LB: loop body
LE: loop exit
PB: predicated region body
PF: predicated region fallthrough
CT: control target
= control target key end

     0   :  { %8 = vsyncpa [#allocation3], 0  ;;  %s225_s0 = inlined_call_operand.hbm [shape: f32[2,256], index: 0, kind: input, shape index: {}]   ;;  %s226_s1 = inlined_call_operand.hbm [shape: f32[2,128], index: 1, kind: output, shape index: {0}]   ;;  %s227_s2 = inlined_call_operand.hbm [shape: f32[2,128], index: 2, kind: output, shape index: {1}]  }
   0x1   :  { %9 = vsyncpa [#allocation4], 0 }
   0x2   :  { %10 = vsyncpa [#allocation7], 0  ;;  %s16_s11 = sshll.u32 %s225_s0, 4  ;;  %s189_s12 = smov [#allocation2]   ;;  %s17_s11 = int_to_ptr.hbm [resolvable:$true] %s16_s11 }
   0x3   :  { %s18_s13 = sshll.u32 %s189_s12, 4  ;;  %s19_s13 = int_to_ptr.vmem [resolvable:$true] %s18_s13 }
   0x4   :  { %21 = dma.hbm_to_vmem [thread:$0]  %s17_s11, 64, %s19_s13, [#allocation3]  }
   0x5   :  { %183 = dma.done.wait [#allocation3], 64  }
   0x6   :  { %184 = vsyncadd [#allocation3], 4294967232  ;;  %v26_v0 = vld [vmem:[#allocation2] sm:$0xf]  ;;  %s190_s14 = smov 96   ;;  %s191_s0 = smov 64  }
   0x7   :  { %28 = vst [vmem:[#allocation1] ss:$4 sm:$0xff] %v26_v0  ;;  %s192_s15 = smov 32   ;;  %vm43_vm0 = vcmask 261120   ;;  %vm45_vm1 = vcmask 523264   ;;  %s193_s16 = smov [#allocation6]  }
   0x8   :  { %s88_s17 = sshll.u32 %s193_s16, 4  ;;  %s90_s20 = sshll.u32 %s227_s2, 4  ;;  %vm47_vm2 = vcmask 785408   ;;  %s89_s17 = int_to_ptr.vmem [resolvable:$true] %s88_s17  ;;  %s91_s20 = int_to_ptr.hbm [resolvable:$true] %s90_s20 }
   0x9   :  { %s194_s21 = smov [#allocation5]   ;;  %s79_s25 = sshll.u32 %s226_s1, 4  ;;  %s80_s25 = int_to_ptr.hbm [resolvable:$true] %s79_s25 }
   0xa   :  { %s77_s22 = sshll.u32 %s194_s21, 4  ;;  %s78_s22 = int_to_ptr.vmem [resolvable:$true] %s77_s22 }
   0xe   :  { %v29_v1 = vld.sshfl [vmem:[#allocation1] sm:$0xff pattern:$0x73625140] }
   0xf   :  { %30 = vrot.lane.b32.xlu0 %v29_v1, %s190_s14  ;;  %33 = vst [vmem:[#allocation1] ss:$4 sm:$0xff] %v26_v0 }
  0x16   :  { %v34_v2 = vld.sshfl [vmem:[#allocation1 + $0x8] sm:$0xff pattern:$0x73625140] }
  0x17   :  { %38 = vst [vmem:[#allocation1] ss:$4 sm:$0xff] %v26_v0 }
  0x1e   :  { %v39_v3 = vld.sshfl [vmem:[#allocation1 + $0x8] sm:$0xff pattern:$0x73625140] }
  0x1f   :  { %50 = vst [vmem:[#allocation1] ss:$4 sm:$0xff] %v26_v0 }
  0x26   :  { %v51_v4 = vld.sshfl [vmem:[#allocation1] sm:$0xff pattern:$0x73625140] }
  0x27   :  { %52 = vrot.lane.b32.xlu0 %v51_v4, %s190_s14  ;;  %55 = vst [vmem:[#allocation1] ss:$4 sm:$0xff] %v26_v0 }
  0x2e   :  { %v56_v5 = vld.sshfl [vmem:[#allocation1] sm:$0xff pattern:$0x73625140] }
  0x2f   :  { %57 = vrot.lane.b32.xlu1 %v56_v5, %s191_s0  ;;  %60 = vst [vmem:[#allocation1] ss:$4 sm:$0xff] %v26_v0 }
  0x36   :  { %v61_v6 = vld.sshfl [vmem:[#allocation1 + $0x8] sm:$0xff pattern:$0x73625140] }
  0x37   :  { %35 = vrot.lane.b32.xlu1 %v34_v2, %s191_s0  ;;  %62 = vrot.lane.b32.xlu2 %v61_v6, %s192_s15  ;;  %65 = vst [vmem:[#allocation1] ss:$4 sm:$0xff] %v26_v0 }
  0x3e   :  { %v66_v11 = vld.sshfl [vmem:[#allocation1 + $0x8] sm:$0xff pattern:$0x73625140] }
  0x3f   :  { %40 = vrot.lane.b32.xlu2 %v39_v3, %s192_s15 }
  0x81   :  { %v31_v7 = vpop.permute.xlu0 %30 }
  0x82   :  { %v44_v16 = vsel %vm43_vm0, %v26_v0, %v31_v7 }
  0x91   :  { %v63_v8 = vpop.permute.xlu2 %62 }
  0x99   :  { %v53_v9 = vpop.permute.xlu0 %52  ;;  %v41_v15 = vpop.permute.xlu2 %40 }
  0xa1   :  { %v58_v10 = vpop.permute.xlu1 %57 }
  0xa2   :  { %v68_v12 = vsel %vm43_vm0, %v53_v9, %v58_v10 }
  0xa3   :  { %v69_v13 = vsel %vm45_vm1, %v68_v12, %v63_v8 }
  0xa4   :  { %v70_v14 = vsel %vm47_vm2, %v69_v13, %v66_v11 }
  0xa5   :  { %71 = vst [vmem:[#allocation6] sm:$0x3] %v70_v14 }
  0xa6   :  { %93 = dma.vmem_to_hbm [thread:$0]  %s89_s17, 32, %s91_s20, [#allocation7]  }
  0xa9   :  { %v36_v17 = vpop.permute.xlu1 %35 }
  0xaa   :  { %v46_v18 = vsel %vm45_vm1, %v44_v16, %v36_v17 }
  0xab   :  { %v48_v19 = vsel %vm47_vm2, %v46_v18, %v41_v15 }
  0xac   :  { %49 = vst [vmem:[#allocation5] sm:$0x3] %v48_v19 }
  0xad   :  { %82 = dma.vmem_to_hbm [thread:$0]  %s78_s22, 32, %s80_s25, [#allocation4]  }
  0xae   :  { %185 = dma.done.wait [#allocation4], 32  }
  0xaf   :  { %186 = vsyncadd [#allocation4], 4294967264 }
  0xb0   :  { %187 = dma.done.wait [#allocation7], 32  }
  0xb1   :  { %188 = vsyncadd [#allocation7], 4294967264 }
  0xb2   :  { %102 = vsyncpa [#allocation3], 1 }
  0xb3   :  { %103 = vsyncpa [#allocation4], 1 }
  0xb4   :  { %104 = vsyncpa [#allocation7], 1 }

</bundles_post_ra>
